<compile_context>
chip_gen: v6e
topology: v6e:2x2x1
jax: 0.10.0
libtpu: 0.0.40
codegen_flags: <defaults>
</compile_context>

<pallas_src>
import math

import jax
import jax.numpy as jnp
from jax.experimental import pallas as pl
from jax.experimental.pallas import tpu as pltpu


_TWO_PI = 2.0 * math.pi
_SCALE_MONTH = _TWO_PI / 12.0
_SCALE_DAY = _TWO_PI / 30.0
_SCALE_HOUR = _TWO_PI / 24.0
_HALF_PI = 0.5 * math.pi


def _dt_embed_kernel(ang_ref, w_ref, b_ref, out_ref):
    """One batch tile of the datetime embedding (batch-major output).

    ang_ref : [8, tb] f32 angles, component-major (batch on the 128-lane axis).
              rows 0..2 = 2*pi*(m/12, d/30, h/24); rows 3..5 = same + pi/2
              (so one dense sin yields both sin and cos); rows 6..7 = 0.
    w_ref   : [8, E]  f32, rows = (w_msin, w_dsin, w_hsin, w_mcos, w_dcos, w_hcos, 0, 0)
    b_ref   : [1, E]  f32
    out_ref : [tb, E] written directly in the PyTorch [B, E] orientation.
    """
    feats = jnp.sin(ang_ref[...])                       # [8, tb]: one lane-dense sin pass
    # Tiny [8, tb] -> [tb, 8] relayout (XLU, hidden under the output DMA),
    # then a single K=8 MXU matmul + bias.
    out = jnp.dot(feats.T, w_ref[...], preferred_element_type=jnp.float32)
    out_ref[...] = (out + b_ref[...]).astype(out_ref.dtype)


def _round_up(x, m):
    return ((x + m - 1) // m) * m


def datetime_embedding(month, day, hour, weight, bias, *,
                       tile_b=2048, out_dtype=jnp.float32):
    """Batched DateTimeEmbeddingWithPeriodicity forward.

    month, day, hour : [B] (any real dtype)
    weight           : [E, 6] PyTorch nn.Linear layout
                       (columns: m_sin, m_cos, d_sin, d_cos, h_sin, h_cos)
    bias             : [E]
    returns          : [B, E] out_dtype (f32 by default; pass bf16 if the
                       consumer accepts it to halve the dominant HBM write)
    """
    B = int(month.shape[0])
    E, K = weight.shape
    assert K == 6, "expected nn.Linear(6, E) weight"

    # ---- batch-tile selection ---------------------------------------------
    if B < 256:
        tb = B                        # single full-extent tile: always a legal block
    else:
        half = _round_up(pl.cdiv(B, 2), 128)     # keep >= 2 grid steps (v7x megacore)
        # Keep double-buffered (tb, E) out + (8, tb) in tiles under ~24 MiB.
        vmem_cap = max(128, ((24 << 20) // (8 * (E + 8))) // 128 * 128)
        tb = max(128, (min(int(tile_b), half, vmem_cap) // 128) * 128)
    num_tiles = pl.cdiv(B, tb)
    b_pad = num_tiles * tb            # input gets padded; output keeps exact B rows

    # ---- angles: component-major [8, B], scales folded in, cos via +pi/2 ---
    m = month.astype(jnp.float32)
    d = day.astype(jnp.float32)
    h = hour.astype(jnp.float32)
    am, ad, ah = m * _SCALE_MONTH, d * _SCALE_DAY, h * _SCALE_HOUR
    zeros = jnp.zeros_like(am)
    ang = jnp.stack([am, ad, ah,
                     am + _HALF_PI, ad + _HALF_PI, ah + _HALF_PI,
                     zeros, zeros], axis=0)                       # [8, B]
    if b_pad != B:
        # Padded columns give finite sin(0)=0 rows; the partial last output
        # block is masked on writeback, so they never reach HBM.
        ang = jnp.pad(ang, ((0, 0), (0, b_pad - B)))

    # ---- combined weight [8, E]: sin rows, cos rows, two zero rows ---------
    w_f32 = weight.astype(jnp.float32)
    w8 = jnp.concatenate([w_f32[:, 0::2],                  # m_sin, d_sin, h_sin
                          w_f32[:, 1::2],                  # m_cos, d_cos, h_cos
                          jnp.zeros((E, 2), jnp.float32)], axis=1).T   # [8, E]
    b_row = bias.astype(jnp.float32).reshape(1, E)

    cost = pl.CostEstimate(
        flops=int(2 * b_pad * 8 * E + B * E),
        transcendentals=int(8 * b_pad),
        bytes_accessed=int(4 * (8 * b_pad + 8 * E + E)
                           + B * E * jnp.dtype(out_dtype).itemsize),
    )

    return pl.pallas_call(
        _dt_embed_kernel,
        out_shape=jax.ShapeDtypeStruct((B, E), out_dtype),
        grid_spec=pl.GridSpec(
            grid=(num_tiles,),
            in_specs=[
                pl.BlockSpec((8, tb), lambda i: (0, i)),    # angles (pipelined)
                pl.BlockSpec((8, E), lambda i: (0, 0)),     # weights (VMEM-resident)
                pl.BlockSpec((1, E), lambda i: (0, 0)),     # bias    (VMEM-resident)
            ],
            out_specs=pl.BlockSpec((tb, E), lambda i: (i, 0)),
        ),
        compiler_params=pltpu.CompilerParams(
            dimension_semantics=("parallel",),              # megacore / 2-TC friendly
            vmem_limit_bytes=32 * 1024 * 1024,              # safe on v5e / v6e / v7x
        ),
        cost_estimate=cost,
    )(ang, w8, b_row)


def _reference(month, day, hour, weight, bias):
    """Pure-JAX reference mirroring the PyTorch forward."""
    m = month.astype(jnp.float32)
    d = day.astype(jnp.float32)
    h = hour.astype(jnp.float32)
    feats = jnp.stack(
        [jnp.sin(_TWO_PI * m / 12.0), jnp.cos(_TWO_PI * m / 12.0),
         jnp.sin(_TWO_PI * d / 30.0), jnp.cos(_TWO_PI * d / 30.0),
         jnp.sin(_TWO_PI * h / 24.0), jnp.cos(_TWO_PI * h / 24.0)],
        axis=1,
    )                                                        # [B, 6]
    return feats @ weight.T + bias[None, :]


if __name__ == "__main__":
    # TODO(synk): minute/second are extracted but unused by the original
    # forward, so they are intentionally not inputs here.
    EMBED_DIM = 256    # module default embedding_dim

    key = jax.random.PRNGKey(0)
    k_w, k_b, k_m, k_d, k_h = jax.random.split(key, 5)

    # Deterministic Linear(6, EMBED_DIM) parameters (PyTorch-style uniform bound),
    # stored in PyTorch's native [E, 6] layout.
    bound = 1.0 / math.sqrt(6.0)
    weight = jax.random.uniform(
        k_w, (EMBED_DIM, 6), jnp.float32, minval=-bound, maxval=bound)
    bias = jax.random.uniform(
        k_b, (EMBED_DIM,), jnp.float32, minval=-bound, maxval=bound)

    # Case 1: small batch, single tile (B < 256 path).
    B1 = 128
    month = jax.random.randint(k_m, (B1,), 1, 13).astype(jnp.float32)
    day = jax.random.randint(k_d, (B1,), 1, 31).astype(jnp.float32)
    hour = jax.random.randint(k_h, (B1,), 0, 24).astype(jnp.float32)
    out1 = jax.block_until_ready(datetime_embedding(month, day, hour, weight, bias))
    ref1 = _reference(month, day, hour, weight, bias)
    assert out1.shape == (B1, EMBED_DIM)
    assert jnp.allclose(out1, ref1, atol=2e-4, rtol=2e-4), "mismatch vs reference (B=128)"

    # Case 2: multi-tile grid with a partial (masked) last output block.
    B2 = 384
    month2 = jax.random.randint(k_m, (B2,), 1, 13).astype(jnp.float32)
    day2 = jax.random.randint(k_d, (B2,), 1, 31).astype(jnp.float32)
    hour2 = jax.random.randint(k_h, (B2,), 0, 24).astype(jnp.float32)
    out2 = jax.block_until_ready(datetime_embedding(month2, day2, hour2, weight, bias))
    ref2 = _reference(month2, day2, hour2, weight, bias)
    assert out2.shape == (B2, EMBED_DIM)
    assert jnp.allclose(out2, ref2, atol=2e-4, rtol=2e-4), "mismatch vs reference (B=384)"

    print("KERNEL_OK")
</pallas_src>

<mosaic_0001>
module attributes {stable_mosaic.version = 11 : i64} {
  func.func @_dt_embed_kernel(%arg0: i32, %arg1: memref<8x128xf32, #tpu.memory_space<vmem>>, %arg2: memref<8x256xf32, #tpu.memory_space<vmem>>, %arg3: memref<1x256xf32, #tpu.memory_space<vmem>>, %arg4: memref<128x256xf32, #tpu.memory_space<vmem>>) attributes {dimension_semantics = [#tpu.dimension_semantics<parallel>], iteration_bounds = array<i64: 1>, scalar_prefetch = 0 : i64, scratch_operands = 0 : i64, tpu.core_type = #tpu.core_type<tc>, window_params = [{transform_indices = @transform_0, window_bounds = array<i64: 8, 128>}, {pipeline_mode = #tpu.pipeline_mode<synchronous>, transform_indices = @transform_1, window_bounds = array<i64: 8, 256>}, {pipeline_mode = #tpu.pipeline_mode<synchronous>, transform_indices = @transform_2, window_bounds = array<i64: 1, 256>}, {transform_indices = @transform_3, window_bounds = array<i64: 128, 256>}]} {
    %c0 = arith.constant 0 : index
    %c0_0 = arith.constant 0 : index
    %0 = vector.load %arg1[%c0, %c0_0] : memref<8x128xf32, #tpu.memory_space<vmem>>, vector<8x128xf32>
    %1 = math.sin %0 : vector<8x128xf32>
    %2 = tpu.transpose %1, [1, 0] : vector<8x128xf32> -> vector<128x8xf32>
    %c0_1 = arith.constant 0 : index
    %c0_2 = arith.constant 0 : index
    %3 = vector.load %arg2[%c0_1, %c0_2] : memref<8x256xf32, #tpu.memory_space<vmem>>, vector<8x256xf32>
    %cst = arith.constant dense<0.000000e+00> : vector<128x256xf32>
    %4 = tpu.matmul %2, %3, %cst {dimension_numbers = #tpu.dot_dimension_numbers<[1], [0], [0], [1], [0, 0, 1, 1], [], []>} : vector<128x8xf32>, vector<8x256xf32>, vector<128x256xf32> -> vector<128x256xf32>
    %c0_3 = arith.constant 0 : index
    %c0_4 = arith.constant 0 : index
    %5 = vector.load %arg3[%c0_3, %c0_4] : memref<1x256xf32, #tpu.memory_space<vmem>>, vector<1x256xf32>
    %6 = vector.broadcast %5 : vector<1x256xf32> to vector<128x256xf32>
    %7 = arith.addf %4, %6 : vector<128x256xf32>
    %c0_5 = arith.constant 0 : index
    %c0_6 = arith.constant 0 : index
    %8 = vector.load %arg4[%c0_5, %c0_6] : memref<128x256xf32, #tpu.memory_space<vmem>>, vector<128x256xf32>
    tpu.vector_store %arg4[%c0_5, %c0_6], %7 {strides = array<i32>} : memref<128x256xf32, #tpu.memory_space<vmem>>, vector<128x256xf32>,
    return
  }
  func.func @transform_0(%arg0: i32) -> (i32, i32) {
    %c0_i32 = arith.constant 0 : i32
    %c0_i32_0 = arith.constant 0 : i32
    return %c0_i32, %arg0 : i32, i32
  }
  func.func @transform_1(%arg0: i32) -> (i32, i32) {
    %c0_i32 = arith.constant 0 : i32
    %c0_i32_0 = arith.constant 0 : i32
    %c0_i32_1 = arith.constant 0 : i32
    return %c0_i32, %c0_i32_0 : i32, i32
  }
  func.func @transform_2(%arg0: i32) -> (i32, i32) {
    %c0_i32 = arith.constant 0 : i32
    %c0_i32_0 = arith.constant 0 : i32
    %c0_i32_1 = arith.constant 0 : i32
    return %c0_i32, %c0_i32_0 : i32, i32
  }
  func.func @transform_3(%arg0: i32) -> (i32, i32) {
    %c0_i32 = arith.constant 0 : i32
    %c0_i32_0 = arith.constant 0 : i32
    return %arg0, %c0_i32 : i32, i32
  }
}

</mosaic_0001>

<bundles_post_ra>
// kernel: tpu_custom_call.1
= control target key start
LH: loop header
LB: loop body
LE: loop exit
PB: predicated region body
PF: predicated region fallthrough
CT: control target
= control target key end

     0   :  { %8 = vsyncpa [#allocation3], 0  ;;  %s691_s0 = inlined_call_operand.hbm [shape: f32[8,128], index: 0, kind: input, shape index: {}]   ;;  %s692_s1 = inlined_call_operand.hbm [shape: f32[8,256], index: 1, kind: input, shape index: {}]   ;;  %s693_s2 = inlined_call_operand.vmem [shape: f32[1,256], index: 2, kind: input, shape index: {}]   ;;  %s694_s3 = inlined_call_operand.hbm [shape: f32[128,256], index: 3, kind: output, shape index: {}]  }
   0x1   :  { %9 = vsyncpa [#allocation6], 0 }
   0x2   :  { %10 = vsyncpa [#allocation4], 0  ;;  %s558_s12 = smov [#allocation2]   ;;  %s559_s14 = smov [#allocation5]  }
   0x3   :  { %s17_s13 = sshll.u32 %s558_s12, 4  ;;  %s27_s15 = sshll.u32 %s559_s14, 4  ;;  %s18_s13 = int_to_ptr.vmem [resolvable:$true] %s17_s13  ;;  %s28_s15 = int_to_ptr.vmem [resolvable:$true] %s27_s15 }
   0x4   :  { %s500_s16 = scalar_lea.vmem %s18_s13, 128  ;;  %p505_p1 = scmp.lt.s32.totalorder %s18_s13, %s18_s13 }
   0x5   :  { %p501_p0 = scmp.ne.s32.totalorder %s18_s13, %s500_s16  ;;  %p506_p2 = scmp.lt.s32.totalorder %s500_s16, %s500_s16 }
   0x7   :  { %p507_p3 = por %p506_p2, %p505_p1 }
   0x9   :  { %p508_p4 = pnand %p507_p3, %p501_p0 }
   0xb   :  { %511 = shalt.err (!%p508_p4)
}
   0xc   :  { %20 = dma.hbm_to_vmem [thread:$0]  %s691_s0, 128, %s18_s13, [#allocation3]  }
   0xd   :  { %s520_s19 = scalar_lea.vmem %s28_s15, 256  ;;  %p525_p6 = scmp.lt.s32.totalorder %s28_s15, %s28_s15 }
   0xe   :  { %p521_p5 = scmp.ne.s32.totalorder %s28_s15, %s520_s19  ;;  %p526_p7 = scmp.lt.s32.totalorder %s520_s19, %s520_s19 }
  0x10   :  { %p527_p8 = por %p526_p7, %p525_p6 }
  0x12   :  { %p528_p9 = pnand %p527_p8, %p521_p5 }
  0x14   :  { %531 = shalt.err (!%p528_p9)
}
  0x15   :  { %30 = dma.hbm_to_vmem [thread:$0]  %s692_s1, 256, %s28_s15, [#allocation6]  }
  0x16   :  { %552 = dma.done.wait [#allocation3], 128  }
  0x17   :  { %553 = vsyncadd [#allocation3], 4294967168 }
  0x18   :  { %554 = dma.done.wait [#allocation6], 256  }
  0x19   :  { %555 = vsyncadd [#allocation6], 4294967040  ;;  %v560_v0 = vmov 0.0   ;;  %v598_v1 = vld [vmem:[#allocation2] sm:$0xff]  ;;  %v177_v2 = vld [vmem:[#allocation5 + $0x8] sm:$0xff]  ;;  %vm190_vm13 = vcmask 64512  }
  0x1a   :  { %303 = vmatprep.mubr.f32.mxu0 %v560_v0  ;;  %351 = vmatprep.mubr.f32.mxu1 %v560_v0  ;;  %v176_v3 = vld [vmem:[#allocation5] sm:$0xff]  ;;  %v43_v4 = vand.u32 2139095040, %v598_v1  ;;  %v40_v6 = vand.u32 2147483647, %v598_v1  ;;  %v561_v15 = vmov 683565275   ;;  %vm132_vm12 = vweird.f32 %v598_v1 }
  0x1b   :  { %269 = vmatprep.subr.mxu0 %v177_v2  ;;  %470 = vmatprep.subr.mxu1 %v177_v2  ;;  %v562_v17 = vmov 2475754826   ;;  %v563_v19 = vmov 2131351028   ;;  %v564_v21 = vmov 2102212464  }
  0x1c   :  { %270 = vmatpush1.msra.mxu0 %v176_v3  ;;  %471 = vmatpush1.msra.mxu1 %v176_v3  ;;  %v44_v5 = vshrl.u32 %v43_v4, 23  ;;  %v47_v9 = vand.u32 8388607, %v40_v6  ;;  %v565_v23 = vmov 920167782   ;;  %vm42_vm7 = vcmp.lt.s32.totalorder %v598_v1, 0 }
  0x1d   :  { %v566_v30 = vmov 1326507024   ;;  %vm41_vm8 = vcmp.le.f32.partialorder %v40_v6, 0.7853982 }
  0x1e   :  { %v450_v7 = vadd.s32 4294967169, %v44_v5  ;;  %v48_v12 = vor.u32 8388608, %v47_v9 }
  0x20   :  { %v50_v8 = vadd.s32 1, %v450_v7  ;;  %v88_v32 = vshll.u32 %v48_v12, 8 }
  0x22   :  { %vm51_vm0 = vcmp.gt.s32.totalorder %v50_v8, 0 }
  0x23   :  { %v52_v10 = vsel %vm51_vm0, %v50_v8, 0 }
  0x24   :  { %v54_v11 = vand.u32 31, %v52_v10  ;;  %v53_v13 = vshrl.u32 %v52_v10, 5 }
  0x26   :  { %v55_v14 = vsub.s32 32, %v54_v11  ;;  %v57_v16 = vshll.u32 %v561_v15, %v54_v11  ;;  %v60_v18 = vshll.u32 %v562_v17, %v54_v11  ;;  %v63_v20 = vshll.u32 %v563_v19, %v54_v11 }
  0x27   :  { %v66_v22 = vshll.u32 %v564_v21, %v54_v11  ;;  %v69_v24 = vshll.u32 %v565_v23, %v54_v11  ;;  %vm72_vm1 = vcmp.lt.s32.totalorder %v53_v13, 1  ;;  %vm75_vm2 = vcmp.lt.s32.totalorder %v53_v13, 4 }
  0x28   :  { %v56_v25 = vshrl.u32 %v561_v15, %v55_v14  ;;  %v58_v26 = vshrl.u32 %v562_v17, %v55_v14  ;;  %v61_v27 = vshrl.u32 %v563_v19, %v55_v14  ;;  %v64_v28 = vshrl.u32 %v564_v21, %v55_v14 }
  0x29   :  { %v67_v29 = vshrl.u32 %v565_v23, %v55_v14  ;;  %v70_v31 = vshrl.u32 %v566_v30, %v55_v14  ;;  %vm73_vm3 = vcmp.lt.s32.totalorder %v53_v13, 2  ;;  %vm74_vm4 = vcmp.lt.s32.totalorder %v53_v13, 3 }
  0x2a   :  { %v59_v33 = vor.u32 %v58_v26, %v57_v16  ;;  %v62_v34 = vor.u32 %v61_v27, %v60_v18  ;;  %v65_v35 = vor.u32 %v64_v28, %v63_v20 }
  0x2b   :  { %v68_v36 = vor.u32 %v67_v29, %v66_v22  ;;  %v71_v37 = vor.u32 %v70_v31, %v69_v24 }
  0x2c   :  { %v76_v38 = vsel %vm72_vm1, %v56_v25, %v59_v33  ;;  %v77_v39 = vsel %vm75_vm2, %v65_v35, 2102212464  ;;  %v80_v40 = vsel %vm72_vm1, %v59_v33, %v62_v34  ;;  %v84_v41 = vsel %vm72_vm1, %v62_v34, %v65_v35 }
  0x2d   :  { %v78_v42 = vsel %vm74_vm4, %v62_v34, %v77_v39  ;;  %v81_v43 = vsel %vm75_vm2, %v68_v36, 920167782  ;;  %v85_v44 = vsel %vm75_vm2, %v71_v37, 1326507024 }
  0x2e   :  { %v82_v45 = vsel %vm74_vm4, %v65_v35, %v81_v43  ;;  %v86_v46 = vsel %vm74_vm4, %v68_v36, %v85_v44  ;;  %v79_v47 = vsel %vm73_vm3, %v76_v38, %v78_v42 }
  0x2f   :  { %v83_v48 = vsel %vm73_vm3, %v80_v40, %v82_v45  ;;  %v87_v49 = vsel %vm73_vm3, %v84_v41, %v86_v46  ;;  %v95_v54 = vmul.u32 %v88_v32, %v79_v47 }
  0x30   :  { %v604_v50 = vmul.u32.u64.low %v88_v32, %v87_v49  ;;  %v605_v51 = vmul.u32.u64.high %v88_v32, %v87_v49, %v604_v50  ;;  %v607_v52 = vmul.u32.u64.low %v88_v32, %v83_v48  ;;  %v608_v53 = vmul.u32.u64.high %v88_v32, %v83_v48, %v607_v52 }
  0x31   :  { %v180_v48 = vlaneseq }
  0x32   :  { %vm97_vm5 = vc.u32 %v605_v51, %v607_v52  ;;  %v98_v55 = vadd.s32 1, %v608_v53  ;;  %v96_v4 = vadd.s32 %v607_v52, %v605_v51  ;;  %v178_v51 = vld [vmem:[%s693_s2] sm:$0x3]  ;;  %s567_s2 = smov [#allocation7]  }
  0x33   :  { %v181_v49 = vshrl.u32 %v180_v48, 7  ;;  %s437_s22 = sshll.u32 %s567_s2, 4  ;;  %s438_s22 = int_to_ptr.vmem [resolvable:$true] %s437_s22 }
  0x34   :  { %v99_v56 = vsel %vm97_vm5, %v98_v55, %v608_v53  ;;  %s532_s23 = scalar_lea.vmem %s438_s22, 4096  ;;  %p537_p11 = scmp.lt.s32.totalorder %s438_s22, %s438_s22 }
  0x35   :  { %v100_v57 = vadd.s32 %v99_v56, %v95_v54  ;;  %v182_v50 = vsub.s32 0, %v181_v49  ;;  %v186_v52 = vsub.s32 1, %v181_v49  ;;  %p533_p10 = scmp.ne.s32.totalorder %s438_s22, %s532_s23  ;;  %p538_p12 = scmp.lt.s32.totalorder %s532_s23, %s532_s23 }
  0x37   :  { %v101_v58 = vadd.s32 536870912, %v100_v57  ;;  %v652_v53 = vrot.slane %v178_v51, %v182_v50  ;;  %v654_v54 = vrot.slane %v178_v51, %v186_v52  ;;  %p539_p13 = por %p538_p12, %p537_p11 }
  0x39   :  { %v102_v59 = vshrl.u32 %v101_v58, 30  ;;  %p540_p0 = pnand %p539_p13, %p533_p10 }
  0x3b   :  { %v103_v60 = vshll.u32 %v102_v59, 30  ;;  %v126_v18 = vsub.s32 4, %v102_v59 }
  0x3d   :  { %v104_v61 = vsub.s32 %v100_v57, %v103_v60  ;;  %v127_v21 = vsel %vm42_vm7, %v126_v18, %v102_v59 }
  0x3e   :  { %v129_v23 = vsel %vm41_vm8, 0, %v127_v21 }
  0x3f   :  { %v106_v62 = vsub.s32 0, %v104_v61  ;;  %v133_v24 = vadd.s32 3, %v129_v23 }
  0x41   :  { %v451_v63 = vmin.u32 %v106_v62, %v104_v61  ;;  %v134_v25 = vand.u32 3, %v133_v24 }
  0x43   :  { %v108_v2 = vclz %v451_v63  ;;  %vm139_vm9 = vcmp.eq.s32.totalorder %v134_v25, 2  ;;  %vm136_vm10 = vcmp.eq.s32.totalorder %v134_v25, 0  ;;  %vm135_vm11 = vcmp.lt.s32.totalorder %v134_v25, 2 }
  0x45   :  { %v452_v3 = vadd.s32 4294967294, %v108_v2 }
  0x47   :  { %vm453_vm6 = vcmp.lt.s32.totalorder %v452_v3, 0 }
  0x48   :  { %v111_v5 = vsel %vm453_vm6, 0, %v452_v3 }
  0x49   :  { %v112_v7 = vsub.s32 32, %v111_v5  ;;  %v113_v8 = vshll.u32 %v104_v61, %v111_v5  ;;  %v116_v9 = vsub.s32 4294967266, %v111_v5 }
  0x4b   :  { %v114_v10 = vshrl.u32 %v96_v4, %v112_v7  ;;  %v117_v11 = vadd.s32 127, %v116_v9 }
  0x4d   :  { %v115_v12 = vor.u32 %v114_v10, %v113_v8  ;;  %v118_v13 = vshll.u32 %v117_v11, 23 }
  0x4f   :  { %v119_v14 = vor.u32 4788187, %v118_v13  ;;  %v122_v15 = vcvt.s32.f32 %v115_v12 }
  0x51   :  { %v120_v16 = vand.u32 2147483647, %v119_v14 }
  0x53   :  { %v123_v17 = vmul.f32 %v122_v15, %v120_v16 }
  0x55   :  { %v124_v19 = vxor.u32 2147483648, %v123_v17 }
  0x57   :  { %v125_v20 = vsel %vm42_vm7, %v124_v19, %v123_v17 }
  0x58   :  { %v128_v22 = vsel %vm41_vm8, %v598_v1, %v125_v20 }
  0x59   :  { %488 = vcosq.f32 %v128_v22 }
  0x5a   :  { %490 = vsinq.f32 %v128_v22 }
  0x66   :  { %v489_v26 = vpop.eup %488 }
  0x67   :  { %v491_v27 = vpop.eup %490  ;;  %v140_v28 = vxor.u32 2147483648, %v489_v26 }
  0x68   :  { %v137_v29 = vxor.u32 2147483648, %v491_v27 }
  0x69   :  { %v141_v6 = vsel %vm139_vm9, %v140_v28, %v491_v27 }
  0x6a   :  { %v138_v30 = vsel %vm136_vm10, %v489_v26, %v137_v29 }
  0x6b   :  { %v142_v31 = vsel %vm135_vm11, %v138_v30, %v141_v6 }
  0x6c   :  { %v143_v32 = vsel %vm132_vm12, nan, %v142_v31 }
  0x6d   :  { %144 = vxpose.xlu0.b32.start.end [1/1] (short) %v143_v32, 128 }
  0xe9   :  { %v160_v33 = vpop.trf.xlu0 }
  0xea   :  { %454 = vmatmul.mubr.msk.f32.vlgmr.msra.gmra.mxu0 %vm190_vm13, %v160_v33 }
  0xeb   :  { %309 = vmatprep.mubr.f32.mxu0 %v560_v0 }
  0xed   :  { %v161_v34 = vpop.trf.xlu0 }
  0xee   :  { %455 = vmatmul.mubr.msk.f32.gmra.mxu0 %vm190_vm13, %v161_v34 }
  0xef   :  { %315 = vmatprep.mubr.f32.mxu0 %v560_v0 }
  0xf1   :  { %v162_v35 = vpop.trf.xlu0 }
  0xf2   :  { %456 = vmatmul.mubr.msk.f32.gmra.mxu0 %vm190_vm13, %v162_v35 }
  0xf3   :  { %321 = vmatprep.mubr.f32.mxu0 %v560_v0 }
  0xf5   :  { %v163_v1 = vpop.trf.xlu0 }
  0xf6   :  { %457 = vmatmul.mubr.msk.f32.gmra.mxu0 %vm190_vm13, %v163_v1 }
  0xf7   :  { %327 = vmatprep.mubr.f32.mxu0 %v560_v0 }
  0xf9   :  { %v164_v36 = vpop.trf.xlu0 }
  0xfa   :  { %458 = vmatmul.mubr.msk.f32.gmra.mxu0 %vm190_vm13, %v164_v36 }
  0xfb   :  { %333 = vmatprep.mubr.f32.mxu0 %v560_v0 }
  0xfd   :  { %v165_v37 = vpop.trf.xlu0 }
  0xfe   :  { %459 = vmatmul.mubr.msk.f32.gmra.mxu0 %vm190_vm13, %v165_v37 }
  0xff   :  { %339 = vmatprep.mubr.f32.mxu0 %v560_v0 }
 0x101   :  { %v166_v38 = vpop.trf.xlu0 }
 0x102   :  { %460 = vmatmul.mubr.msk.f32.gmra.mxu0 %vm190_vm13, %v166_v38 }
 0x103   :  { %345 = vmatprep.mubr.f32.mxu0 %v560_v0 }
 0x105   :  { %v167_v39 = vpop.trf.xlu0 }
 0x106   :  { %461 = vmatmul.mubr.msk.f32.gmra.mxu0 %vm190_vm13, %v167_v39 }
 0x109   :  { %v168_v40 = vpop.trf.xlu0 }
 0x10a   :  { %462 = vmatmul.mubr.msk.f32.vlgmr.msra.gmra.mxu1 %vm190_vm13, %v168_v40 }
 0x10b   :  { %357 = vmatprep.mubr.f32.mxu1 %v560_v0 }
 0x10d   :  { %v169_v41 = vpop.trf.xlu0 }
 0x10e   :  { %463 = vmatmul.mubr.msk.f32.gmra.mxu1 %vm190_vm13, %v169_v41 }
 0x10f   :  { %363 = vmatprep.mubr.f32.mxu1 %v560_v0 }
 0x111   :  { %v170_v42 = vpop.trf.xlu0 }
 0x112   :  { %464 = vmatmul.mubr.msk.f32.gmra.mxu1 %vm190_vm13, %v170_v42 }
 0x113   :  { %369 = vmatprep.mubr.f32.mxu1 %v560_v0 }
 0x115   :  { %v171_v43 = vpop.trf.xlu0 }
 0x116   :  { %465 = vmatmul.mubr.msk.f32.gmra.mxu1 %vm190_vm13, %v171_v43 }
 0x117   :  { %375 = vmatprep.mubr.f32.mxu1 %v560_v0 }
 0x119   :  { %v172_v44 = vpop.trf.xlu0 }
 0x11a   :  { %466 = vmatmul.mubr.msk.f32.gmra.mxu1 %vm190_vm13, %v172_v44 }
 0x11b   :  { %381 = vmatprep.mubr.f32.mxu1 %v560_v0 }
 0x11d   :  { %v173_v45 = vpop.trf.xlu0 }
 0x11e   :  { %467 = vmatmul.mubr.msk.f32.gmra.mxu1 %vm190_vm13, %v173_v45 }
 0x11f   :  { %387 = vmatprep.mubr.f32.mxu1 %v560_v0 }
 0x121   :  { %v174_v46 = vpop.trf.xlu0 }
 0x122   :  { %468 = vmatmul.mubr.msk.f32.gmra.mxu1 %vm190_vm13, %v174_v46 }
 0x123   :  { %393 = vmatprep.mubr.f32.mxu1 %v560_v0 }
 0x125   :  { %v175_v47 = vpop.trf.xlu0 }
 0x126   :  { %469 = vmatmul.mubr.msk.f32.gmra.mxu1 %vm190_vm13, %v175_v47 }
 0x1aa   :  { %v305_v55 = vpop.f32.mrf.mxu0 }
 0x1ab   :  { %v306_v56 = vadd.f32 %v305_v55, %v652_v53 }
 0x1ac   :  { %v307_v57 = vpop.f32.mrf.mxu0 }
 0x1ad   :  { %400 = vst [vmem:[#allocation7] sm:$0xff] %v306_v56  ;;  %v308_v0 = vadd.f32 %v307_v57, %v654_v54 }
 0x1ae   :  { %v311_v58 = vpop.f32.mrf.mxu0 }
 0x1af   :  { %401 = vst [vmem:[#allocation7 + $0x8] sm:$0xff] %v308_v0  ;;  %v312_v59 = vadd.f32 %v311_v58, %v652_v53 }
 0x1b0   :  { %v313_v60 = vpop.f32.mrf.mxu0 }
 0x1b1   :  { %402 = vst [vmem:[#allocation7 + $0x10] sm:$0xff] %v312_v59  ;;  %v314_v61 = vadd.f32 %v313_v60, %v654_v54 }
 0x1b2   :  { %v317_v62 = vpop.f32.mrf.mxu0 }
 0x1b3   :  { %403 = vst [vmem:[#allocation7 + $0x18] sm:$0xff] %v314_v61  ;;  %v318_v63 = vadd.f32 %v317_v62, %v652_v53 }
 0x1b4   :  { %v319_v2 = vpop.f32.mrf.mxu0 }
 0x1b5   :  { %404 = vst [vmem:[#allocation7 + $0x20] sm:$0xff] %v318_v63  ;;  %v320_v3 = vadd.f32 %v319_v2, %v654_v54 }
 0x1b6   :  { %v323_v4 = vpop.f32.mrf.mxu0 }
 0x1b7   :  { %405 = vst [vmem:[#allocation7 + $0x28] sm:$0xff] %v320_v3  ;;  %v324_v5 = vadd.f32 %v323_v4, %v652_v53 }
 0x1b8   :  { %v325_v7 = vpop.f32.mrf.mxu0 }
 0x1b9   :  { %406 = vst [vmem:[#allocation7 + $0x30] sm:$0xff] %v324_v5  ;;  %v326_v8 = vadd.f32 %v325_v7, %v654_v54 }
 0x1ba   :  { %v329_v9 = vpop.f32.mrf.mxu0 }
 0x1bb   :  { %407 = vst [vmem:[#allocation7 + $0x38] sm:$0xff] %v326_v8  ;;  %v330_v10 = vadd.f32 %v329_v9, %v652_v53 }
 0x1bc   :  { %v331_v11 = vpop.f32.mrf.mxu0 }
 0x1bd   :  { %408 = vst [vmem:[#allocation7 + $0x40] sm:$0xff] %v330_v10  ;;  %v332_v12 = vadd.f32 %v331_v11, %v654_v54 }
 0x1be   :  { %v335_v13 = vpop.f32.mrf.mxu0 }
 0x1bf   :  { %409 = vst [vmem:[#allocation7 + $0x48] sm:$0xff] %v332_v12  ;;  %v336_v14 = vadd.f32 %v335_v13, %v652_v53 }
 0x1c0   :  { %v337_v15 = vpop.f32.mrf.mxu0 }
 0x1c1   :  { %410 = vst [vmem:[#allocation7 + $0x50] sm:$0xff] %v336_v14  ;;  %v338_v16 = vadd.f32 %v337_v15, %v654_v54 }
 0x1c2   :  { %v341_v17 = vpop.f32.mrf.mxu0 }
 0x1c3   :  { %411 = vst [vmem:[#allocation7 + $0x58] sm:$0xff] %v338_v16  ;;  %v342_v18 = vadd.f32 %v341_v17, %v652_v53 }
 0x1c4   :  { %v343_v19 = vpop.f32.mrf.mxu0 }
 0x1c5   :  { %412 = vst [vmem:[#allocation7 + $0x60] sm:$0xff] %v342_v18  ;;  %v344_v20 = vadd.f32 %v343_v19, %v654_v54 }
 0x1c6   :  { %v347_v21 = vpop.f32.mrf.mxu0 }
 0x1c7   :  { %413 = vst [vmem:[#allocation7 + $0x68] sm:$0xff] %v344_v20  ;;  %v348_v22 = vadd.f32 %v347_v21, %v652_v53 }
 0x1c8   :  { %v349_v23 = vpop.f32.mrf.mxu0 }
 0x1c9   :  { %414 = vst [vmem:[#allocation7 + $0x70] sm:$0xff] %v348_v22  ;;  %v350_v24 = vadd.f32 %v349_v23, %v654_v54 }
 0x1ca   :  { %v353_v25 = vpop.f32.mrf.mxu1 }
 0x1cb   :  { %415 = vst [vmem:[#allocation7 + $0x78] sm:$0xff] %v350_v24  ;;  %v354_v26 = vadd.f32 %v353_v25, %v652_v53 }
 0x1cc   :  { %v355_v27 = vpop.f32.mrf.mxu1 }
 0x1cd   :  { %416 = vst [vmem:[#allocation7 + $0x80] sm:$0xff] %v354_v26  ;;  %v356_v28 = vadd.f32 %v355_v27, %v654_v54 }
 0x1ce   :  { %v359_v29 = vpop.f32.mrf.mxu1 }
 0x1cf   :  { %417 = vst [vmem:[#allocation7 + $0x88] sm:$0xff] %v356_v28  ;;  %v360_v6 = vadd.f32 %v359_v29, %v652_v53 }
 0x1d0   :  { %v361_v30 = vpop.f32.mrf.mxu1 }
 0x1d1   :  { %418 = vst [vmem:[#allocation7 + $0x90] sm:$0xff] %v360_v6  ;;  %v362_v31 = vadd.f32 %v361_v30, %v654_v54 }
 0x1d2   :  { %v365_v32 = vpop.f32.mrf.mxu1 }
 0x1d3   :  { %419 = vst [vmem:[#allocation7 + $0x98] sm:$0xff] %v362_v31  ;;  %v366_v33 = vadd.f32 %v365_v32, %v652_v53 }
 0x1d4   :  { %v367_v34 = vpop.f32.mrf.mxu1 }
 0x1d5   :  { %420 = vst [vmem:[#allocation7 + $0xa0] sm:$0xff] %v366_v33  ;;  %v368_v35 = vadd.f32 %v367_v34, %v654_v54 }
 0x1d6   :  { %v371_v1 = vpop.f32.mrf.mxu1 }
 0x1d7   :  { %421 = vst [vmem:[#allocation7 + $0xa8] sm:$0xff] %v368_v35  ;;  %v372_v36 = vadd.f32 %v371_v1, %v652_v53 }
 0x1d8   :  { %v373_v37 = vpop.f32.mrf.mxu1 }
 0x1d9   :  { %422 = vst [vmem:[#allocation7 + $0xb0] sm:$0xff] %v372_v36  ;;  %v374_v38 = vadd.f32 %v373_v37, %v654_v54 }
 0x1da   :  { %v377_v39 = vpop.f32.mrf.mxu1 }
 0x1db   :  { %423 = vst [vmem:[#allocation7 + $0xb8] sm:$0xff] %v374_v38  ;;  %v378_v40 = vadd.f32 %v377_v39, %v652_v53 }
 0x1dc   :  { %v379_v41 = vpop.f32.mrf.mxu1 }
 0x1dd   :  { %424 = vst [vmem:[#allocation7 + $0xc0] sm:$0xff] %v378_v40  ;;  %v380_v42 = vadd.f32 %v379_v41, %v654_v54 }
 0x1de   :  { %v383_v43 = vpop.f32.mrf.mxu1 }
 0x1df   :  { %425 = vst [vmem:[#allocation7 + $0xc8] sm:$0xff] %v380_v42  ;;  %v384_v44 = vadd.f32 %v383_v43, %v652_v53 }
 0x1e0   :  { %v385_v45 = vpop.f32.mrf.mxu1 }
 0x1e1   :  { %426 = vst [vmem:[#allocation7 + $0xd0] sm:$0xff] %v384_v44  ;;  %v386_v46 = vadd.f32 %v385_v45, %v654_v54 }
 0x1e2   :  { %v389_v47 = vpop.f32.mrf.mxu1 }
 0x1e3   :  { %427 = vst [vmem:[#allocation7 + $0xd8] sm:$0xff] %v386_v46  ;;  %v390_v48 = vadd.f32 %v389_v47, %v652_v53 }
 0x1e4   :  { %v391_v49 = vpop.f32.mrf.mxu1 }
 0x1e5   :  { %428 = vst [vmem:[#allocation7 + $0xe0] sm:$0xff] %v390_v48  ;;  %v392_v50 = vadd.f32 %v391_v49, %v654_v54 }
 0x1e6   :  { %v395_v51 = vpop.f32.mrf.mxu1 }
 0x1e7   :  { %429 = vst [vmem:[#allocation7 + $0xe8] sm:$0xff] %v392_v50  ;;  %v396_v52 = vadd.f32 %v395_v51, %v652_v53 }
 0x1e8   :  { %v397_v55 = vpop.f32.mrf.mxu1 }
 0x1e9   :  { %430 = vst [vmem:[#allocation7 + $0xf0] sm:$0xff] %v396_v52  ;;  %v398_v56 = vadd.f32 %v397_v55, %v654_v54 }
 0x1eb   :  { %431 = vst [vmem:[#allocation7 + $0xf8] sm:$0xff] %v398_v56 }
 0x1ec   :  { %543 = shalt.err (!%p540_p0)
}
 0x1ed   :  { %s568_s24 = smov 256   ;;  %s569_s25 = smov 16  }
 0x1ee   :  { %443 = dma.vmem_to_hbm [thread:$0]  %s438_s22, 4096, %s694_s3, [#allocation4], %s568_s24, %s568_s24, %s569_s25  }
 0x1ef   :  { %556 = dma.done.wait [#allocation4], 4096  }
 0x1f0   :  { %557 = vsyncadd [#allocation4], 4294963200 }
 0x1f1   :  { %447 = vsyncpa [#allocation3], 1 }
 0x1f2   :  { %448 = vsyncpa [#allocation6], 1 }
 0x1f3   :  { %449 = vsyncpa [#allocation4], 1 }

</bundles_post_ra>
